<compile_context>
chip_gen: v6e
topology: v6e:2x2x1
jax: 0.10.0
libtpu: 0.0.40
codegen_flags: <defaults>
</compile_context>

<pallas_src>
import functools

import jax
import jax.numpy as jnp
from jax.experimental import pallas as pl
from jax.experimental.pallas import tpu as pltpu

_LANE = 128


# ------------------------------ small helpers ------------------------------ #

def _round_up(v, m):
    return (v + m - 1) // m * m


def _pad_axis(x, target, axis):
    pad = target - x.shape[axis]
    if pad <= 0:
        return x
    widths = [(0, 0)] * x.ndim
    widths[axis] = (0, pad)
    return jnp.pad(x, widths)


def _pad_last2(x, rows, cols):
    return _pad_axis(_pad_axis(x, cols, x.ndim - 1), rows, x.ndim - 2)


def bn_fold(gamma, beta, mean, var, eps=1e-5):
    scale = gamma / jnp.sqrt(var + eps)
    return scale, beta - mean * scale


# ---------------------- device-adaptive VMEM budgeting ---------------------- #

def _vmem_capacity_bytes():
    try:
        info = pltpu.get_tpu_info()
        for name in ("vmem_capacity_bytes", "vmem_bytes", "vmem_size_bytes"):
            v = getattr(info, name, None)
            if v:
                return int(v)
    except Exception:
        pass
    return 64 * 1024 * 1024          # conservative: assume v7x (64 MiB / TC)


_BIG_VMEM = _vmem_capacity_bytes() >= 96 * 1024 * 1024
# v5e/v6e (128 MiB VMEM): bigger tiles + higher scoped limit hide low HBM BW.
# v7x (64 MiB VMEM): keep headroom; bf16 outputs let tm=512 fit comfortably.
_VMEM_LIMIT = (96 if _BIG_VMEM else 40) * 1024 * 1024
_TM_DEFAULT = 1024 if _BIG_VMEM else 512


# ----------------------------- Pallas kernels ------------------------------ #

def _mm_bias_act_kernel(x_ref, w_ref, b_ref, o_ref, *, relu):
    """out = maybe_relu(x @ w_scaled + bias); x/w bf16, f32 accumulate."""
    acc = jnp.dot(x_ref[...], w_ref[...], preferred_element_type=jnp.float32)
    acc = acc + b_ref[...]
    if relu:
        acc = jnp.maximum(acc, 0.0)
    o_ref[...] = acc.astype(o_ref.dtype)


def _mm_bias_residual_kernel(h_ref, w_ref, b_ref, r_ref, o_ref):
    """conv3 + bn3 + identity residual + relu, fused."""
    acc = jnp.dot(h_ref[...], w_ref[...], preferred_element_type=jnp.float32)
    acc = acc + b_ref[...] + r_ref[...].astype(jnp.float32)
    o_ref[...] = jnp.maximum(acc, 0.0).astype(o_ref.dtype)


def _mm_bias_proj_residual_kernel(h_ref, w3_ref, b3_ref, xs_ref, ws_ref, bs_ref,
                                  o_ref):
    """conv3 + bn3 + (shortcut 1x1 conv + bns) + add + relu, fused."""
    acc = jnp.dot(h_ref[...], w3_ref[...], preferred_element_type=jnp.float32)
    acc = acc + jnp.dot(xs_ref[...], ws_ref[...],
                        preferred_element_type=jnp.float32)
    acc = acc + b3_ref[...] + bs_ref[...]
    o_ref[...] = jnp.maximum(acc, 0.0).astype(o_ref.dtype)


def _conv3x3_bn_relu_kernel(x_ref, w_ref, b_ref, o_ref, *, stride, tho, Wo):
    """3x3 conv (pad=1, stride) + folded-BN bias + ReLU, one (image, row-block).

    x_ref : (1, s, Hq, Wc, 3*C)  width-expanded input: the 3 horizontal (kw)
            taps are packed along channels; rows are split into the s vertical
            stride phases.
    w_ref : (3, 3*C, Cout)       per-kh weights (kw packed along K).

    Three K=3*C MXU matmuls; f32 accumulation chained from the first dot (no
    zero-init round trip).  All in-kernel slices are along outer dims, so no
    lane/sublane re-layout copies are generated.
    """
    s = stride
    Wc = x_ref.shape[3]
    K = x_ref.shape[4]
    Cout = w_ref.shape[-1]
    r0 = pl.program_id(1) * tho
    acc = None
    for kh in range(3):
        rows = x_ref[0, kh % s, pl.ds(r0 + kh // s, tho), :, :]   # (tho, Wc, K)
        part = jnp.dot(rows.reshape(tho * Wc, K), w_ref[kh],
                       preferred_element_type=jnp.float32)
        acc = part if acc is None else acc + part
    out = jnp.maximum(acc + b_ref[...], 0.0).reshape(tho, Wc, Cout)
    if Wc != Wo:                       # single masked slice at store time only
        out = out[:, :Wo, :]
    o_ref[0] = out.astype(o_ref.dtype)


# --------------------------- pallas_call wrappers --------------------------- #

def _row_call(kernel, args, row_tiled, M, n_out, out_dtype, tm=None):
    """Row-tiled fused matmul call: args tiled along rows where row_tiled[i]."""
    tm = _TM_DEFAULT if tm is None else tm
    tm = min(tm, _round_up(M, 16))     # bf16 operands: 16-sublane alignment
    in_specs = []
    for a, tiled in zip(args, row_tiled):
        if tiled:
            in_specs.append(pl.BlockSpec((tm, a.shape[1]), lambda i: (i, 0)))
        else:  # grid-invariant (weights / biases), resident in VMEM
            in_specs.append(pl.BlockSpec(a.shape, lambda i, nd=a.ndim: (0,) * nd))
    return pl.pallas_call(
        kernel,
        out_shape=jax.ShapeDtypeStruct((M, n_out), out_dtype),
        grid=(pl.cdiv(M, tm),),
        in_specs=in_specs,
        out_specs=pl.BlockSpec((tm, n_out), lambda i: (i, 0)),
        compiler_params=pltpu.CompilerParams(
            dimension_semantics=("parallel",),
            vmem_limit_bytes=_VMEM_LIMIT),
    )(*args)


def _conv2_call(xw, w_cat, bias, Ho, Wo, stride, tho):
    N, s, Hq, Wc, K = xw.shape
    Pp = w_cat.shape[-1]
    nb = Ho // tho                     # tho always divides Ho (see picker)
    return pl.pallas_call(
        functools.partial(_conv3x3_bn_relu_kernel, stride=stride, tho=tho,
                          Wo=Wo),
        out_shape=jax.ShapeDtypeStruct((N, Ho, Wo, Pp), jnp.bfloat16),
        grid=(N, nb),
        in_specs=[
            pl.BlockSpec((1, s, Hq, Wc, K), lambda n, b: (n, 0, 0, 0, 0)),
            pl.BlockSpec((3, K, Pp), lambda n, b: (0, 0, 0)),
            pl.BlockSpec((1, Pp), lambda n, b: (0, 0)),
        ],
        out_specs=pl.BlockSpec((1, tho, Wo, Pp), lambda n, b: (n, b, 0, 0)),
        compiler_params=pltpu.CompilerParams(
            dimension_semantics=("parallel", "parallel"),
            vmem_limit_bytes=_VMEM_LIMIT),
    )(xw, w_cat, bias)


# ----------------------------- conv2 preparation ---------------------------- #

def _pick_conv2_rows(Ho, Wc, cout_p, override=None):
    """Output rows per conv2 grid step; always a divisor of Ho."""
    if override is not None:
        tho = int(override)
    else:
        # keep the f32 accumulator around <=1 MiB so it stays near the vreg
        # file and the grid has enough steps for pipelining / megacore split.
        tho = max(8, (1 << 20) // (Wc * cout_p * 4))
    tho = max(1, min(tho, Ho))
    while Ho % tho:
        tho -= 1
    return tho


def _conv2_prep(h1, stride, tho):
    """Zero-pad h1 and pack the 3 horizontal taps along channels.

    Returns xw of shape (N, s, Hq, Wc, 3*C) with
      xw[n, ph, i, j, kw*C:(kw+1)*C] == h1_padded[n, i*s + ph, j*s + kw, :]
    so the 3x3 conv becomes 3 matmuls with K = 3*C (one per vertical tap).
    """
    N, H, W, C = h1.shape
    s = stride
    Ho = (H - 1) // s + 1
    Wo = (W - 1) // s + 1
    Hq = max(Ho + 2 // s, -(-(H + 2) // s))
    Wc = _round_up(Wo, 8)              # free in-kernel (rows, Wc) merge
    Hp = Hq * s
    Wp = max((Wc - 1) * s + 3, W + 2)
    xpad = jnp.pad(h1, ((0, 0), (1, Hp - H - 1), (1, Wp - W - 1), (0, 0)))
    cols = [xpad[:, :, kw: kw + Wc * s: s, :] for kw in range(3)]
    xw = jnp.concatenate(cols, axis=-1)                   # (N, Hp, Wc, 3C)
    if s == 1:
        xw = xw[:, None]               # fast path: no phase transpose needed
    else:
        xw = xw.reshape(N, Hq, s, Wc, 3 * C).transpose(0, 2, 1, 3, 4)
    return xw, Ho, Wo


# ------------------------------- forward pass ------------------------------- #

def bottleneck_forward(x_nchw, params, stride, conv2_row_block=None):
    """Pallas implementation of Bottleneck.forward. Input/output are NCHW f32."""
    p = params
    N, Cin, H, W = x_nchw.shape
    planes = p["w1"].shape[0]
    Cout = 4 * planes
    Cin_p = _round_up(Cin, _LANE)
    Pp = _round_up(planes, _LANE)
    Cout_p = _round_up(Cout, _LANE)
    s = stride

    # NCHW -> NHWC once at the module boundary; lane-pad channels; bf16 acts.
    # TODO(synk): both boundary transposes disappear if the surrounding model
    # stays NHWC end to end.
    x_nhwc = jnp.transpose(x_nchw, (0, 2, 3, 1))
    x_b = _pad_axis(x_nhwc, Cin_p, 3).astype(jnp.bfloat16)

    # ---- fold BN scale into weights (bias kept separate in f32) ----
    s1, b1 = bn_fold(*p["bn1"])
    s2, b2 = bn_fold(*p["bn2"])
    s3, b3 = bn_fold(*p["bn3"])

    w1p = _pad_last2(p["w1"][:, :, 0, 0].T * s1[None, :],
                     Cin_p, Pp).astype(jnp.bfloat16)               # (Cin_p, Pp)
    b1p = _pad_axis(b1[None, :], Pp, 1).astype(jnp.float32)

    # conv2 weights: (3,3,Cin,Cout) -> pad -> (3, 3*Pp, Pp), kw packed into K.
    w2 = jnp.transpose(p["w2"], (2, 3, 1, 0)) * s2[None, None, None, :]
    w2p = _pad_last2(w2, Pp, Pp).reshape(3, 3 * Pp, Pp).astype(jnp.bfloat16)
    b2p = _pad_axis(b2[None, :], Pp, 1).astype(jnp.float32)

    w3p = _pad_last2(p["w3"][:, :, 0, 0].T * s3[None, :],
                     Pp, Cout_p).astype(jnp.bfloat16)              # (Pp, Cout_p)
    b3p = _pad_axis(b3[None, :], Cout_p, 1).astype(jnp.float32)

    # ---- conv1 (1x1) + bn1 + relu : one fused MXU matmul ----
    M1 = N * H * W
    h1 = _row_call(functools.partial(_mm_bias_act_kernel, relu=True),
                   [x_b.reshape(M1, Cin_p), w1p, b1p],
                   [True, False, False], M1, Pp, jnp.bfloat16)
    h1 = h1.reshape(N, H, W, Pp)

    # ---- conv2 (3x3, stride, pad=1) + bn2 + relu : 3 K=3C matmuls / block ----
    Ho = (H - 1) // s + 1
    Wo = (W - 1) // s + 1
    Wc = _round_up(Wo, 8)
    tho = _pick_conv2_rows(Ho, Wc, Pp, conv2_row_block)
    xw, Ho, Wo = _conv2_prep(h1, s, tho)
    h2 = _conv2_call(xw, w2p, b2p, Ho, Wo, s, tho)                  # bf16 NHWC

    # ---- conv3 (1x1) + bn3 + shortcut + add + relu : single fused kernel ----
    M2 = N * Ho * Wo
    h2d = h2.reshape(M2, Pp)
    if s != 1 or Cin != Cout:
        ss_, bs_ = bn_fold(*p["bns"])
        wsp = _pad_last2(p["ws"][:, :, 0, 0].T * ss_[None, :],
                         Cin_p, Cout_p).astype(jnp.bfloat16)
        bsp = _pad_axis(bs_[None, :], Cout_p, 1).astype(jnp.float32)
        # TODO(synk): fold this strided downsample into the fused kernel's
        # BlockSpec/DMA instead of materializing it in XLA.
        xs = x_b[:, ::s, ::s, :][:, :Ho, :Wo, :].reshape(M2, Cin_p)
        out2d = _row_call(_mm_bias_proj_residual_kernel,
                          [h2d, w3p, b3p, xs, wsp, bsp],
                          [True, False, False, True, False, False],
                          M2, Cout_p, jnp.bfloat16)
    else:
        # identity residual: lane padding must line up exactly.
        assert Cin == Cout and Cin_p == Cout_p
        # TODO(synk): when stacking many Bottlenecks, keep this residual path
        # in f32 to avoid bf16 error accumulation across the stack.
        res = x_b.reshape(M2, Cin_p)
        out2d = _row_call(_mm_bias_residual_kernel,
                          [h2d, w3p, b3p, res],
                          [True, False, False, True],
                          M2, Cout_p, jnp.bfloat16)

    # bf16 writeback; channel un-pad only when Cout is not lane aligned.
    out2d = out2d if Cout == Cout_p else out2d[:, :Cout]
    out = out2d.reshape(N, Ho, Wo, Cout)
    return jnp.transpose(out, (0, 3, 1, 2)).astype(jnp.float32)     # NCHW f32


# --------------------------- pure-JAX f32 reference ------------------------- #

def bottleneck_reference(x, p, stride):
    def conv(x, w, s=1, pad=0):
        return jax.lax.conv_general_dilated(
            x, w, (s, s), [(pad, pad), (pad, pad)],
            dimension_numbers=("NCHW", "OIHW", "NCHW"))

    def bn(x, g, b, m, v, eps=1e-5):
        sc = g / jnp.sqrt(v + eps)
        return x * sc[None, :, None, None] + (b - m * sc)[None, :, None, None]

    out = jax.nn.relu(bn(conv(x, p["w1"]), *p["bn1"]))
    out = jax.nn.relu(bn(conv(out, p["w2"], stride, 1), *p["bn2"]))
    out = bn(conv(out, p["w3"]), *p["bn3"])
    if stride != 1 or x.shape[1] != p["w3"].shape[0]:
        sc = bn(conv(x, p["ws"], stride), *p["bns"])
    else:
        sc = x
    return jax.nn.relu(out + sc)


# --------------------------------- main ------------------------------------ #

def make_params(key, in_planes, planes):
    cout = 4 * planes
    ks = jax.random.split(key, 8)

    def bn_params(k, c):
        k1, k2, k3, k4 = jax.random.split(k, 4)
        gamma = jax.random.uniform(k1, (c,), jnp.float32, 0.5, 1.5)
        beta = 0.1 * jax.random.normal(k2, (c,), jnp.float32)
        mean = 0.1 * jax.random.normal(k3, (c,), jnp.float32)
        var = jax.random.uniform(k4, (c,), jnp.float32, 0.5, 1.5)
        return (gamma, beta, mean, var)

    return {
        "w1": 0.2 * jax.random.normal(ks[0], (planes, in_planes, 1, 1), jnp.float32),
        "w2": 0.2 * jax.random.normal(ks[1], (planes, planes, 3, 3), jnp.float32),
        "w3": 0.2 * jax.random.normal(ks[2], (cout, planes, 1, 1), jnp.float32),
        "ws": 0.2 * jax.random.normal(ks[3], (cout, in_planes, 1, 1), jnp.float32),
        "bn1": bn_params(ks[4], planes),
        "bn2": bn_params(ks[5], planes),
        "bn3": bn_params(ks[6], cout),
        "bns": bn_params(ks[7], cout),
    }


if __name__ == "__main__":
    key = jax.random.PRNGKey(0)
    k1, k2, k3, k4 = jax.random.split(key, 4)

    # Config A: projection shortcut (stride=2, channel expansion 8 -> 16);
    # conv2 row block 4 -> 2 spatial row-blocks per image.
    in_planes, planes, stride = 8, 4, 2
    x = jax.random.normal(k1, (2, in_planes, 16, 16), jnp.float32)   # NCHW
    params = make_params(k2, in_planes, planes)
    out = jax.block_until_ready(
        bottleneck_forward(x, params, stride, conv2_row_block=4))
    ref = jax.block_until_ready(bottleneck_reference(x, params, stride))
    assert out.shape == ref.shape == (2, 16, 8, 8), out.shape
    assert jnp.allclose(out, ref, rtol=5e-2, atol=5e-2), \
        float(jnp.max(jnp.abs(out - ref)))

    # Config B: identity shortcut (stride=1, in_planes == 4*planes);
    # conv2 row block 4 -> 4 spatial row-blocks per image.
    in_planes_b, planes_b, stride_b = 16, 4, 1
    xb = jax.random.normal(k3, (2, in_planes_b, 16, 16), jnp.float32)
    params_b = make_params(k4, in_planes_b, planes_b)
    out_b = jax.block_until_ready(
        bottleneck_forward(xb, params_b, stride_b, conv2_row_block=4))
    ref_b = jax.block_until_ready(bottleneck_reference(xb, params_b, stride_b))
    assert out_b.shape == ref_b.shape == (2, 16, 16, 16), out_b.shape
    assert jnp.allclose(out_b, ref_b, rtol=5e-2, atol=5e-2), \
        float(jnp.max(jnp.abs(out_b - ref_b)))

    # Config B again with the auto-picked conv2 row block (single block).
    out_b2 = jax.block_until_ready(bottleneck_forward(xb, params_b, stride_b))
    assert jnp.allclose(out_b2, ref_b, rtol=5e-2, atol=5e-2), \
        float(jnp.max(jnp.abs(out_b2 - ref_b)))

    print("KERNEL_OK")
</pallas_src>

<mosaic_0001>
module attributes {stable_mosaic.version = 11 : i64} {
  func.func @_mm_bias_act_kernel(%arg0: i32, %arg1: memref<512x128xbf16, #tpu.memory_space<vmem>>, %arg2: memref<128x128xbf16, #tpu.memory_space<vmem>>, %arg3: memref<1x128xf32, #tpu.memory_space<vmem>>, %arg4: memref<512x128xbf16, #tpu.memory_space<vmem>>) attributes {dimension_semantics = [#tpu.dimension_semantics<parallel>], iteration_bounds = array<i64: 1>, scalar_prefetch = 0 : i64, scratch_operands = 0 : i64, tpu.core_type = #tpu.core_type<tc>, window_params = [{transform_indices = @transform_0, window_bounds = array<i64: 512, 128>}, {pipeline_mode = #tpu.pipeline_mode<synchronous>, transform_indices = @transform_1, window_bounds = array<i64: 128, 128>}, {pipeline_mode = #tpu.pipeline_mode<synchronous>, transform_indices = @transform_2, window_bounds = array<i64: 1, 128>}, {transform_indices = @transform_3, window_bounds = array<i64: 512, 128>}]} {
    %c0 = arith.constant 0 : index
    %c0_0 = arith.constant 0 : index
    %0 = vector.load %arg1[%c0, %c0_0] : memref<512x128xbf16, #tpu.memory_space<vmem>>, vector<512x128xbf16>
    %c0_1 = arith.constant 0 : index
    %c0_2 = arith.constant 0 : index
    %1 = vector.load %arg2[%c0_1, %c0_2] : memref<128x128xbf16, #tpu.memory_space<vmem>>, vector<128x128xbf16>
    %cst = arith.constant dense<0.000000e+00> : vector<512x128xf32>
    %2 = tpu.matmul %0, %1, %cst {dimension_numbers = #tpu.dot_dimension_numbers<[1], [0], [0], [1], [0, 0, 1, 1], [], []>} : vector<512x128xbf16>, vector<128x128xbf16>, vector<512x128xf32> -> vector<512x128xf32>
    %c0_3 = arith.constant 0 : index
    %c0_4 = arith.constant 0 : index
    %3 = vector.load %arg3[%c0_3, %c0_4] : memref<1x128xf32, #tpu.memory_space<vmem>>, vector<1x128xf32>
    %4 = vector.broadcast %3 : vector<1x128xf32> to vector<512x128xf32>
    %5 = arith.addf %2, %4 : vector<512x128xf32>
    %cst_5 = arith.constant 0.000000e+00 : f32
    %6 = vector.broadcast %cst_5 : f32 to vector<512x128xf32>
    %7 = arith.maximumf %5, %6 : vector<512x128xf32>
    %8 = arith.truncf %7 : vector<512x128xf32> to vector<512x128xbf16>
    %c0_6 = arith.constant 0 : index
    %c0_7 = arith.constant 0 : index
    %9 = vector.load %arg4[%c0_6, %c0_7] : memref<512x128xbf16, #tpu.memory_space<vmem>>, vector<512x128xbf16>
    tpu.vector_store %arg4[%c0_6, %c0_7], %8 {strides = array<i32>} : memref<512x128xbf16, #tpu.memory_space<vmem>>, vector<512x128xbf16>,
    return
  }
  func.func @transform_0(%arg0: i32) -> (i32, i32) {
    %c0_i32 = arith.constant 0 : i32
    %c0_i32_0 = arith.constant 0 : i32
    return %arg0, %c0_i32 : i32, i32
  }
  func.func @transform_1(%arg0: i32) -> (i32, i32) {
    %c0_i32 = arith.constant 0 : i32
    %c0_i32_0 = arith.constant 0 : i32
    %c0_i32_1 = arith.constant 0 : i32
    return %c0_i32, %c0_i32_0 : i32, i32
  }
  func.func @transform_2(%arg0: i32) -> (i32, i32) {
    %c0_i32 = arith.constant 0 : i32
    %c0_i32_0 = arith.constant 0 : i32
    %c0_i32_1 = arith.constant 0 : i32
    return %c0_i32, %c0_i32_0 : i32, i32
  }
  func.func @transform_3(%arg0: i32) -> (i32, i32) {
    %c0_i32 = arith.constant 0 : i32
    %c0_i32_0 = arith.constant 0 : i32
    return %arg0, %c0_i32 : i32, i32
  }
}

</mosaic_0001>

<bundles_post_ra>
// kernel: tpu_custom_call.1
= control target key start
LH: loop header
LB: loop body
LE: loop exit
PB: predicated region body
PF: predicated region fallthrough
CT: control target
= control target key end

     0   :  { %8 = vsyncpa [#allocation3], 0  ;;  %s1781_s0 = inlined_call_operand.hbm [shape: bf16[512,128], index: 0, kind: input, shape index: {}]   ;;  %s1782_s1 = inlined_call_operand.hbm [shape: bf16[128,128], index: 1, kind: input, shape index: {}]   ;;  %s1783_s2 = inlined_call_operand.vmem [shape: f32[1,128], index: 2, kind: input, shape index: {}]   ;;  %s1784_s3 = inlined_call_operand.hbm [shape: bf16[512,128], index: 3, kind: output, shape index: {}]  }
   0x1   :  { %9 = vsyncpa [#allocation6], 0 }
   0x2   :  { %10 = vsyncpa [#allocation4], 0  ;;  %s1669_s12 = smov [#allocation2]  }
   0x3   :  { %s16_s13 = sshll.u32 %s1669_s12, 4  ;;  %s17_s13 = int_to_ptr.vmem [resolvable:$true] %s16_s13 }
   0x4   :  { %s1611_s14 = scalar_lea.vmem %s17_s13, 4096  ;;  %p1616_p1 = scmp.lt.s32.totalorder %s17_s13, %s17_s13 }
   0x5   :  { %p1612_p0 = scmp.ne.s32.totalorder %s17_s13, %s1611_s14  ;;  %p1617_p2 = scmp.lt.s32.totalorder %s1611_s14, %s1611_s14 }
   0x7   :  { %p1618_p3 = por %p1617_p2, %p1616_p1 }
   0x9   :  { %p1619_p4 = pnand %p1618_p3, %p1612_p0 }
   0xb   :  { %1622 = shalt.err (!%p1619_p4)
}
   0xc   :  { %s1670_s15 = smov 64   ;;  %s1671_s16 = smov 4  }
   0xd   :  { %22 = dma.hbm_to_vmem [thread:$0]  %s1781_s0, 4096, %s17_s13, [#allocation3], %s1670_s15, %s1670_s15, %s1671_s16  }
   0xe   :  { %s1672_s19 = smov [#allocation5]  }
   0xf   :  { %s28_s20 = sshll.u32 %s1672_s19, 4  ;;  %s29_s20 = int_to_ptr.vmem [resolvable:$true] %s28_s20 }
  0x10   :  { %s1631_s21 = scalar_lea.vmem %s29_s20, 1024  ;;  %p1636_p6 = scmp.lt.s32.totalorder %s29_s20, %s29_s20 }
  0x11   :  { %p1632_p5 = scmp.ne.s32.totalorder %s29_s20, %s1631_s21  ;;  %p1637_p7 = scmp.lt.s32.totalorder %s1631_s21, %s1631_s21 }
  0x13   :  { %p1638_p8 = por %p1637_p7, %p1636_p6 }
  0x15   :  { %p1639_p9 = pnand %p1638_p8, %p1632_p5 }
  0x17   :  { %1642 = shalt.err (!%p1639_p9)
}
  0x18   :  { %34 = dma.hbm_to_vmem [thread:$0]  %s1782_s1, 1024, %s29_s20, [#allocation6], %s1670_s15, %s1670_s15, %s1671_s16  }
  0x19   :  { %1663 = dma.done.wait [#allocation3], 4096  }
  0x1a   :  { %1664 = vsyncadd [#allocation3], 4294963200 }
  0x1b   :  { %1665 = dma.done.wait [#allocation6], 1024  }
  0x1c   :  { %1666 = vsyncadd [#allocation6], 4294966272  ;;  %v1563_v0 = vld [vmem:[#allocation5 + $0x38] sm:$0xff]   ;;  %v1564_v1 = vld [vmem:[#allocation5 + $0x30] sm:$0xff]  }
  0x1d   :  { %1462 = vmatprep.subr.bf16.mxu0 %v1563_v0  ;;  %1542 = vmatprep.subr.bf16.mxu1 %v1563_v0  ;;  %v1565_v2 = vld [vmem:[#allocation5 + $0x28] sm:$0xff]   ;;  %v1566_v3 = vld [vmem:[#allocation5 + $0x20] sm:$0xff]   ;;  %v1567_v6 = vld [vmem:[#allocation5 + $0x18] sm:$0xff]  }
  0x1e   :  { %1463 = vmatpush3.bf16.msra.mxu0 %v1563_v0  ;;  %1550 = vmatpush3.bf16.msra.mxu1 %v1563_v0  ;;  %v1571_v4 = vld [vmem:[#allocation2] sm:$0xff]   ;;  %v1568_v7 = vld [vmem:[#allocation5 + $0x10] sm:$0xff]   ;;  %v1569_v8 = vld [vmem:[#allocation5 + $0x8] sm:$0xff]  }
  0x1f   :  { %1464 = vmatprep.subr.bf16.mxu0 %v1564_v1  ;;  %1543 = vmatprep.subr.bf16.mxu1 %v1564_v1  ;;  %v1572_v5 = vld [vmem:[#allocation2 + $0x80] sm:$0xff]   ;;  %v1573_v10 = vld [vmem:[#allocation2 + $0x8] sm:$0xff]   ;;  %v1575_v12 = vld [vmem:[#allocation2 + $0x10] sm:$0xff]  }
  0x20   :  { %1478 = vmatprep.mubr.bf16.mxu0 %v1571_v4  ;;  %1510 = vmatprep.mubr.bf16.mxu1 %v1572_v5  ;;  %v1570_v9 = vld [vmem:[#allocation5] sm:$0xff]   ;;  %v1574_v11 = vld [vmem:[#allocation2 + $0x88] sm:$0xff]   ;;  %v1576_v13 = vld [vmem:[#allocation2 + $0x90] sm:$0xff]  }
  0x21   :  { %v1577_v14 = vld [vmem:[#allocation2 + $0x18] sm:$0xff]   ;;  %v1579_v16 = vld [vmem:[#allocation2 + $0x20] sm:$0xff]   ;;  %v1581_v18 = vld [vmem:[#allocation2 + $0x28] sm:$0xff]  }
  0x22   :  { %1465 = vmatpush3.bf16.msra.mxu0 %v1564_v1  ;;  %1551 = vmatpush3.bf16.msra.mxu1 %v1564_v1  ;;  %v1578_v15 = vld [vmem:[#allocation2 + $0x98] sm:$0xff]   ;;  %v1580_v17 = vld [vmem:[#allocation2 + $0xa0] sm:$0xff]   ;;  %v1582_v19 = vld [vmem:[#allocation2 + $0xa8] sm:$0xff]  }
  0x23   :  { %1466 = vmatprep.subr.bf16.mxu0 %v1565_v2  ;;  %1544 = vmatprep.subr.bf16.mxu1 %v1565_v2  ;;  %v1583_v20 = vld [vmem:[#allocation2 + $0x30] sm:$0xff]   ;;  %v1585_v22 = vld [vmem:[#allocation2 + $0x38] sm:$0xff]   ;;  %v1587_v24 = vld [vmem:[#allocation2 + $0x40] sm:$0xff]  }
  0x24   :  { %v1584_v21 = vld [vmem:[#allocation2 + $0xb0] sm:$0xff]   ;;  %v1586_v23 = vld [vmem:[#allocation2 + $0xb8] sm:$0xff]   ;;  %v1588_v25 = vld [vmem:[#allocation2 + $0xc0] sm:$0xff]  }
  0x25   :  { %v1589_v26 = vld [vmem:[#allocation2 + $0x48] sm:$0xff]   ;;  %v1591_v28 = vld [vmem:[#allocation2 + $0x50] sm:$0xff]   ;;  %v1593_v30 = vld [vmem:[#allocation2 + $0x58] sm:$0xff]  }
  0x26   :  { %1467 = vmatpush3.bf16.msra.mxu0 %v1565_v2  ;;  %1552 = vmatpush3.bf16.msra.mxu1 %v1565_v2  ;;  %v1590_v27 = vld [vmem:[#allocation2 + $0xc8] sm:$0xff]   ;;  %v1592_v29 = vld [vmem:[#allocation2 + $0xd0] sm:$0xff]   ;;  %v1594_v31 = vld [vmem:[#allocation2 + $0xd8] sm:$0xff]  }
  0x27   :  { %1468 = vmatprep.subr.bf16.mxu0 %v1566_v3  ;;  %1545 = vmatprep.subr.bf16.mxu1 %v1566_v3  ;;  %v1595_v32 = vld [vmem:[#allocation2 + $0x60] sm:$0xff]   ;;  %v1597_v34 = vld [vmem:[#allocation2 + $0x68] sm:$0xff]   ;;  %v1599_v36 = vld [vmem:[#allocation2 + $0x70] sm:$0xff]  }
  0x28   :  { %v1596_v33 = vld [vmem:[#allocation2 + $0xe0] sm:$0xff]   ;;  %v1598_v35 = vld [vmem:[#allocation2 + $0xe8] sm:$0xff]   ;;  %v1600_v37 = vld [vmem:[#allocation2 + $0xf0] sm:$0xff]  }
  0x29   :  { %v1601_v38 = vld [vmem:[#allocation2 + $0x78] sm:$0xff]   ;;  %v1709_v40 = vld [vmem:[%s1783_s2] ss:$0 sm:$0xff]  ;;  %s1673_s2 = smov [#allocation7]  }
  0x2a   :  { %1469 = vmatpush3.bf16.msra.mxu0 %v1566_v3  ;;  %1553 = vmatpush3.bf16.msra.mxu1 %v1566_v3  ;;  %v1602_v39 = vld [vmem:[#allocation2 + $0xf8] sm:$0xff]   ;;  %s1049_s24 = sshll.u32 %s1673_s2, 4  ;;  %s1050_s24 = int_to_ptr.vmem [resolvable:$true] %s1049_s24 }
  0x2b   :  { %1470 = vmatprep.subr.bf16.mxu0 %v1567_v6  ;;  %1546 = vmatprep.subr.bf16.mxu1 %v1567_v6  ;;  %s1643_s25 = scalar_lea.vmem %s1050_s24, 4096  ;;  %p1648_p11 = scmp.lt.s32.totalorder %s1050_s24, %s1050_s24 }
  0x2c   :  { %p1644_p10 = scmp.ne.s32.totalorder %s1050_s24, %s1643_s25  ;;  %p1649_p12 = scmp.lt.s32.totalorder %s1643_s25, %s1643_s25 }
  0x2e   :  { %1471 = vmatpush3.bf16.msra.mxu0 %v1567_v6  ;;  %1554 = vmatpush3.bf16.msra.mxu1 %v1567_v6  ;;  %p1650_p13 = por %p1649_p12, %p1648_p11 }
  0x2f   :  { %1472 = vmatprep.subr.bf16.mxu0 %v1568_v7  ;;  %1547 = vmatprep.subr.bf16.mxu1 %v1568_v7 }
  0x30   :  { %p1651_p0 = pnand %p1650_p13, %p1644_p10 }
  0x32   :  { %1473 = vmatpush3.bf16.msra.mxu0 %v1568_v7  ;;  %1555 = vmatpush3.bf16.msra.mxu1 %v1568_v7 }
  0x33   :  { %1474 = vmatprep.subr.bf16.mxu0 %v1569_v8  ;;  %1548 = vmatprep.subr.bf16.mxu1 %v1569_v8 }
  0x36   :  { %1475 = vmatpush3.bf16.msra.mxu0 %v1569_v8  ;;  %1556 = vmatpush3.bf16.msra.mxu1 %v1569_v8 }
  0x37   :  { %1476 = vmatprep.subr.bf16.mxu0 %v1570_v9  ;;  %1549 = vmatprep.subr.bf16.mxu1 %v1570_v9 }
  0x3a   :  { %1477 = vmatpush3.bf16.msra.mxu0 %v1570_v9  ;;  %1557 = vmatpush3.bf16.msra.mxu1 %v1570_v9 }
  0x3d   :  { %1479 = vmatmul.mubr.bf16.vlgmr.msra.gmra.mxu0 %v1573_v10  ;;  %1511 = vmatmul.mubr.bf16.vlgmr.msra.gmra.mxu1 %v1574_v11 }
  0x3e   :  { %1482 = vmatprep.mubr.bf16.mxu0 %v1575_v12  ;;  %1514 = vmatprep.mubr.bf16.mxu1 %v1576_v13 }
  0x45   :  { %1483 = vmatmul.mubr.bf16.gmra.mxu0 %v1577_v14  ;;  %1515 = vmatmul.mubr.bf16.gmra.mxu1 %v1578_v15 }
  0x46   :  { %1486 = vmatprep.mubr.bf16.mxu0 %v1579_v16  ;;  %1518 = vmatprep.mubr.bf16.mxu1 %v1580_v17 }
  0x4d   :  { %1487 = vmatmul.mubr.bf16.gmra.mxu0 %v1581_v18  ;;  %1519 = vmatmul.mubr.bf16.gmra.mxu1 %v1582_v19 }
  0x4e   :  { %1490 = vmatprep.mubr.bf16.mxu0 %v1583_v20  ;;  %1522 = vmatprep.mubr.bf16.mxu1 %v1584_v21 }
  0x55   :  { %1491 = vmatmul.mubr.bf16.gmra.mxu0 %v1585_v22  ;;  %1523 = vmatmul.mubr.bf16.gmra.mxu1 %v1586_v23 }
  0x56   :  { %1494 = vmatprep.mubr.bf16.mxu0 %v1587_v24  ;;  %1526 = vmatprep.mubr.bf16.mxu1 %v1588_v25 }
  0x5d   :  { %1495 = vmatmul.mubr.bf16.gmra.mxu0 %v1589_v26  ;;  %1527 = vmatmul.mubr.bf16.gmra.mxu1 %v1590_v27 }
  0x5e   :  { %1498 = vmatprep.mubr.bf16.mxu0 %v1591_v28  ;;  %1530 = vmatprep.mubr.bf16.mxu1 %v1592_v29 }
  0x65   :  { %1499 = vmatmul.mubr.bf16.gmra.mxu0 %v1593_v30  ;;  %1531 = vmatmul.mubr.bf16.gmra.mxu1 %v1594_v31 }
  0x66   :  { %1502 = vmatprep.mubr.bf16.mxu0 %v1595_v32  ;;  %1534 = vmatprep.mubr.bf16.mxu1 %v1596_v33 }
  0x6d   :  { %1503 = vmatmul.mubr.bf16.gmra.mxu0 %v1597_v34  ;;  %1535 = vmatmul.mubr.bf16.gmra.mxu1 %v1598_v35 }
  0x6e   :  { %1506 = vmatprep.mubr.bf16.mxu0 %v1599_v36  ;;  %1538 = vmatprep.mubr.bf16.mxu1 %v1600_v37 }
  0x75   :  { %1507 = vmatmul.mubr.bf16.gmra.mxu0 %v1601_v38  ;;  %1539 = vmatmul.mubr.bf16.gmra.mxu1 %v1602_v39 }
  0xfd   :  { %v1480_v41 = vpop.f32.mrf.mxu0  ;;  %v1512_v42 = vpop.f32.mrf.mxu1 }
  0xfe   :  { %v414_v43 = vadd.f32 %v1480_v41, %v1709_v40  ;;  %v542_v44 = vadd.f32 %v1512_v42, %v1709_v40 }
  0xff   :  { %v405_v45 = vpop.f32.mrf.mxu0  ;;  %v533_v46 = vpop.f32.mrf.mxu1 }
 0x100   :  { %v406_v47 = vadd.f32 %v1709_v40, %v405_v45  ;;  %v534_v48 = vadd.f32 %v1709_v40, %v533_v46  ;;  %v662_v53 = vmax.f32 %v414_v43, 0.0  ;;  %v694_v54 = vmax.f32 %v542_v44, 0.0 }
 0x101   :  { %v1481_v49 = vpop.f32.mrf.mxu0  ;;  %v1513_v50 = vpop.f32.mrf.mxu1 }
 0x102   :  { %v417_v51 = vadd.f32 %v1481_v49, %v1709_v40  ;;  %v545_v52 = vadd.f32 %v1513_v50, %v1709_v40  ;;  %v660_v61 = vmax.f32 %v406_v47, 0.0  ;;  %v692_v62 = vmax.f32 %v534_v48, 0.0 }
 0x103   :  { %v408_v55 = vpop.f32.mrf.mxu0  ;;  %v536_v56 = vpop.f32.mrf.mxu1 }
 0x104   :  { %v663_v57 = vmax.f32 %v417_v51, 0.0  ;;  %v695_v58 = vmax.f32 %v545_v52, 0.0  ;;  %v409_v59 = vadd.f32 %v1709_v40, %v408_v55  ;;  %v537_v60 = vadd.f32 %v1709_v40, %v536_v56 }
 0x105   :  { %v1484_v63 = vpop.f32.mrf.mxu0  ;;  %v1516_v0 = vpop.f32.mrf.mxu1 }
 0x106   :  { %v1239_v1 = vpack.c.bf16 %v663_v57, %v662_v53  ;;  %v1319_v2 = vpack.c.bf16 %v695_v58, %v694_v54  ;;  %v661_v3 = vmax.f32 %v409_v59, 0.0  ;;  %v693_v4 = vmax.f32 %v537_v60, 0.0 }
 0x107   :  { %v430_v5 = vadd.f32 %v1484_v63, %v1709_v40  ;;  %v558_v6 = vadd.f32 %v1516_v0, %v1709_v40  ;;  %v421_v7 = vpop.f32.mrf.mxu0  ;;  %v549_v8 = vpop.f32.mrf.mxu1 }
 0x108   :  { %1391 = vst [vmem:[#allocation7 + $0x8] sm:$0xff] %v1239_v1   ;;  %1407 = vst [vmem:[#allocation7 + $0x88] sm:$0xff] %v1319_v2   ;;  %v1234_v9 = vpack.c.bf16 %v661_v3, %v660_v61  ;;  %v1314_v10 = vpack.c.bf16 %v693_v4, %v692_v62  ;;  %v422_v11 = vadd.f32 %v1709_v40, %v421_v7 }
 0x109   :  { %v550_v12 = vadd.f32 %v1709_v40, %v549_v8  ;;  %v1485_v13 = vpop.f32.mrf.mxu0  ;;  %v1517_v14 = vpop.f32.mrf.mxu1  ;;  %v666_v17 = vmax.f32 %v430_v5, 0.0  ;;  %v698_v18 = vmax.f32 %v558_v6, 0.0 }
 0x10a   :  { %1235 = vst [vmem:[#allocation7] sm:$0xff] %v1234_v9   ;;  %1406 = vst [vmem:[#allocation7 + $0x80] sm:$0xff] %v1314_v10   ;;  %v433_v15 = vadd.f32 %v1485_v13, %v1709_v40  ;;  %v561_v16 = vadd.f32 %v1517_v14, %v1709_v40  ;;  %v664_v25 = vmax.f32 %v422_v11, 0.0 }
 0x10b   :  { %v424_v19 = vpop.f32.mrf.mxu0  ;;  %v552_v20 = vpop.f32.mrf.mxu1  ;;  %v696_v26 = vmax.f32 %v550_v12, 0.0 }
 0x10c   :  { %v667_v21 = vmax.f32 %v433_v15, 0.0  ;;  %v699_v22 = vmax.f32 %v561_v16, 0.0  ;;  %v425_v23 = vadd.f32 %v1709_v40, %v424_v19  ;;  %v553_v24 = vadd.f32 %v1709_v40, %v552_v20 }
 0x10d   :  { %v1488_v27 = vpop.f32.mrf.mxu0  ;;  %v1520_v28 = vpop.f32.mrf.mxu1 }
 0x10e   :  { %v1249_v29 = vpack.c.bf16 %v667_v21, %v666_v17  ;;  %v1329_v30 = vpack.c.bf16 %v699_v22, %v698_v18  ;;  %v665_v31 = vmax.f32 %v425_v23, 0.0  ;;  %v697_v32 = vmax.f32 %v553_v24, 0.0 }
 0x10f   :  { %v446_v33 = vadd.f32 %v1488_v27, %v1709_v40  ;;  %v574_v34 = vadd.f32 %v1520_v28, %v1709_v40  ;;  %v437_v35 = vpop.f32.mrf.mxu0  ;;  %v565_v36 = vpop.f32.mrf.mxu1 }
 0x110   :  { %1393 = vst [vmem:[#allocation7 + $0x18] sm:$0xff] %v1249_v29   ;;  %1409 = vst [vmem:[#allocation7 + $0x98] sm:$0xff] %v1329_v30   ;;  %v1244_v37 = vpack.c.bf16 %v665_v31, %v664_v25  ;;  %v1324_v38 = vpack.c.bf16 %v697_v32, %v696_v26  ;;  %v438_v39 = vadd.f32 %v1709_v40, %v437_v35 }
 0x111   :  { %v566_v41 = vadd.f32 %v1709_v40, %v565_v36  ;;  %v1489_v42 = vpop.f32.mrf.mxu0  ;;  %v1521_v43 = vpop.f32.mrf.mxu1  ;;  %v670_v46 = vmax.f32 %v446_v33, 0.0  ;;  %v702_v47 = vmax.f32 %v574_v34, 0.0 }
 0x112   :  { %1392 = vst [vmem:[#allocation7 + $0x10] sm:$0xff] %v1244_v37   ;;  %1408 = vst [vmem:[#allocation7 + $0x90] sm:$0xff] %v1324_v38   ;;  %v449_v44 = vadd.f32 %v1489_v42, %v1709_v40  ;;  %v577_v45 = vadd.f32 %v1521_v43, %v1709_v40  ;;  %v668_v54 = vmax.f32 %v438_v39, 0.0 }
 0x113   :  { %v440_v48 = vpop.f32.mrf.mxu0  ;;  %v568_v49 = vpop.f32.mrf.mxu1  ;;  %v700_v55 = vmax.f32 %v566_v41, 0.0 }
 0x114   :  { %v671_v50 = vmax.f32 %v449_v44, 0.0  ;;  %v703_v51 = vmax.f32 %v577_v45, 0.0  ;;  %v441_v52 = vadd.f32 %v1709_v40, %v440_v48  ;;  %v569_v53 = vadd.f32 %v1709_v40, %v568_v49 }
 0x115   :  { %v1492_v56 = vpop.f32.mrf.mxu0  ;;  %v1524_v57 = vpop.f32.mrf.mxu1 }
 0x116   :  { %v1259_v58 = vpack.c.bf16 %v671_v50, %v670_v46  ;;  %v1339_v59 = vpack.c.bf16 %v703_v51, %v702_v47  ;;  %v669_v60 = vmax.f32 %v441_v52, 0.0  ;;  %v701_v61 = vmax.f32 %v569_v53, 0.0 }
 0x117   :  { %v462_v62 = vadd.f32 %v1492_v56, %v1709_v40  ;;  %v590_v63 = vadd.f32 %v1524_v57, %v1709_v40  ;;  %v453_v0 = vpop.f32.mrf.mxu0  ;;  %v581_v1 = vpop.f32.mrf.mxu1 }
 0x118   :  { %1395 = vst [vmem:[#allocation7 + $0x28] sm:$0xff] %v1259_v58   ;;  %1411 = vst [vmem:[#allocation7 + $0xa8] sm:$0xff] %v1339_v59   ;;  %v1254_v2 = vpack.c.bf16 %v669_v60, %v668_v54  ;;  %v1334_v3 = vpack.c.bf16 %v701_v61, %v700_v55  ;;  %v454_v4 = vadd.f32 %v1709_v40, %v453_v0 }
 0x119   :  { %v582_v5 = vadd.f32 %v1709_v40, %v581_v1  ;;  %v1493_v6 = vpop.f32.mrf.mxu0  ;;  %v1525_v7 = vpop.f32.mrf.mxu1  ;;  %v674_v10 = vmax.f32 %v462_v62, 0.0  ;;  %v706_v11 = vmax.f32 %v590_v63, 0.0 }
 0x11a   :  { %1394 = vst [vmem:[#allocation7 + $0x20] sm:$0xff] %v1254_v2   ;;  %1410 = vst [vmem:[#allocation7 + $0xa0] sm:$0xff] %v1334_v3   ;;  %v465_v8 = vadd.f32 %v1493_v6, %v1709_v40  ;;  %v593_v9 = vadd.f32 %v1525_v7, %v1709_v40  ;;  %v672_v18 = vmax.f32 %v454_v4, 0.0 }
 0x11b   :  { %v456_v12 = vpop.f32.mrf.mxu0  ;;  %v584_v13 = vpop.f32.mrf.mxu1  ;;  %v704_v19 = vmax.f32 %v582_v5, 0.0 }
 0x11c   :  { %v675_v14 = vmax.f32 %v465_v8, 0.0  ;;  %v707_v15 = vmax.f32 %v593_v9, 0.0  ;;  %v457_v16 = vadd.f32 %v1709_v40, %v456_v12  ;;  %v585_v17 = vadd.f32 %v1709_v40, %v584_v13 }
 0x11d   :  { %v1496_v20 = vpop.f32.mrf.mxu0  ;;  %v1528_v21 = vpop.f32.mrf.mxu1 }
 0x11e   :  { %v1269_v22 = vpack.c.bf16 %v675_v14, %v674_v10  ;;  %v1349_v23 = vpack.c.bf16 %v707_v15, %v706_v11  ;;  %v673_v24 = vmax.f32 %v457_v16, 0.0  ;;  %v705_v25 = vmax.f32 %v585_v17, 0.0 }
 0x11f   :  { %v478_v26 = vadd.f32 %v1496_v20, %v1709_v40  ;;  %v606_v27 = vadd.f32 %v1528_v21, %v1709_v40  ;;  %v469_v28 = vpop.f32.mrf.mxu0  ;;  %v597_v29 = vpop.f32.mrf.mxu1 }
 0x120   :  { %1397 = vst [vmem:[#allocation7 + $0x38] sm:$0xff] %v1269_v22   ;;  %1413 = vst [vmem:[#allocation7 + $0xb8] sm:$0xff] %v1349_v23   ;;  %v1264_v30 = vpack.c.bf16 %v673_v24, %v672_v18  ;;  %v1344_v31 = vpack.c.bf16 %v705_v25, %v704_v19  ;;  %v470_v32 = vadd.f32 %v1709_v40, %v469_v28 }
 0x121   :  { %v598_v33 = vadd.f32 %v1709_v40, %v597_v29  ;;  %v1497_v34 = vpop.f32.mrf.mxu0  ;;  %v1529_v35 = vpop.f32.mrf.mxu1  ;;  %v678_v38 = vmax.f32 %v478_v26, 0.0  ;;  %v710_v39 = vmax.f32 %v606_v27, 0.0 }
 0x122   :  { %1396 = vst [vmem:[#allocation7 + $0x30] sm:$0xff] %v1264_v30   ;;  %1412 = vst [vmem:[#allocation7 + $0xb0] sm:$0xff] %v1344_v31   ;;  %v481_v36 = vadd.f32 %v1497_v34, %v1709_v40  ;;  %v609_v37 = vadd.f32 %v1529_v35, %v1709_v40  ;;  %v676_v47 = vmax.f32 %v470_v32, 0.0 }
 0x123   :  { %v472_v41 = vpop.f32.mrf.mxu0  ;;  %v600_v42 = vpop.f32.mrf.mxu1  ;;  %v708_v48 = vmax.f32 %v598_v33, 0.0 }
 0x124   :  { %v679_v43 = vmax.f32 %v481_v36, 0.0  ;;  %v711_v44 = vmax.f32 %v609_v37, 0.0  ;;  %v473_v45 = vadd.f32 %v1709_v40, %v472_v41  ;;  %v601_v46 = vadd.f32 %v1709_v40, %v600_v42 }
 0x125   :  { %v1500_v49 = vpop.f32.mrf.mxu0  ;;  %v1532_v50 = vpop.f32.mrf.mxu1 }
 0x126   :  { %v1279_v51 = vpack.c.bf16 %v679_v43, %v678_v38  ;;  %v1359_v52 = vpack.c.bf16 %v711_v44, %v710_v39  ;;  %v677_v53 = vmax.f32 %v473_v45, 0.0  ;;  %v709_v54 = vmax.f32 %v601_v46, 0.0 }
 0x127   :  { %v494_v55 = vadd.f32 %v1500_v49, %v1709_v40  ;;  %v622_v56 = vadd.f32 %v1532_v50, %v1709_v40  ;;  %v485_v57 = vpop.f32.mrf.mxu0  ;;  %v613_v58 = vpop.f32.mrf.mxu1 }
 0x128   :  { %1399 = vst [vmem:[#allocation7 + $0x48] sm:$0xff] %v1279_v51   ;;  %1415 = vst [vmem:[#allocation7 + $0xc8] sm:$0xff] %v1359_v52   ;;  %v1274_v59 = vpack.c.bf16 %v677_v53, %v676_v47  ;;  %v1354_v60 = vpack.c.bf16 %v709_v54, %v708_v48  ;;  %v486_v61 = vadd.f32 %v1709_v40, %v485_v57 }
 0x129   :  { %v614_v62 = vadd.f32 %v1709_v40, %v613_v58  ;;  %v1501_v63 = vpop.f32.mrf.mxu0  ;;  %v1533_v0 = vpop.f32.mrf.mxu1  ;;  %v682_v3 = vmax.f32 %v494_v55, 0.0  ;;  %v714_v4 = vmax.f32 %v622_v56, 0.0 }
 0x12a   :  { %1398 = vst [vmem:[#allocation7 + $0x40] sm:$0xff] %v1274_v59   ;;  %1414 = vst [vmem:[#allocation7 + $0xc0] sm:$0xff] %v1354_v60   ;;  %v497_v1 = vadd.f32 %v1501_v63, %v1709_v40  ;;  %v625_v2 = vadd.f32 %v1533_v0, %v1709_v40  ;;  %v680_v11 = vmax.f32 %v486_v61, 0.0 }
 0x12b   :  { %v488_v5 = vpop.f32.mrf.mxu0  ;;  %v616_v6 = vpop.f32.mrf.mxu1  ;;  %v712_v12 = vmax.f32 %v614_v62, 0.0 }
 0x12c   :  { %v683_v7 = vmax.f32 %v497_v1, 0.0  ;;  %v715_v8 = vmax.f32 %v625_v2, 0.0  ;;  %v489_v9 = vadd.f32 %v1709_v40, %v488_v5  ;;  %v617_v10 = vadd.f32 %v1709_v40, %v616_v6 }
 0x12d   :  { %v1504_v13 = vpop.f32.mrf.mxu0  ;;  %v1536_v14 = vpop.f32.mrf.mxu1 }
 0x12e   :  { %v1289_v15 = vpack.c.bf16 %v683_v7, %v682_v3  ;;  %v1369_v16 = vpack.c.bf16 %v715_v8, %v714_v4  ;;  %v681_v17 = vmax.f32 %v489_v9, 0.0  ;;  %v713_v18 = vmax.f32 %v617_v10, 0.0 }
 0x12f   :  { %v510_v19 = vadd.f32 %v1504_v13, %v1709_v40  ;;  %v638_v20 = vadd.f32 %v1536_v14, %v1709_v40  ;;  %v501_v21 = vpop.f32.mrf.mxu0  ;;  %v629_v22 = vpop.f32.mrf.mxu1 }
 0x130   :  { %1401 = vst [vmem:[#allocation7 + $0x58] sm:$0xff] %v1289_v15   ;;  %1417 = vst [vmem:[#allocation7 + $0xd8] sm:$0xff] %v1369_v16   ;;  %v1284_v23 = vpack.c.bf16 %v681_v17, %v680_v11  ;;  %v1364_v24 = vpack.c.bf16 %v713_v18, %v712_v12  ;;  %v502_v25 = vadd.f32 %v1709_v40, %v501_v21 }
 0x131   :  { %v630_v26 = vadd.f32 %v1709_v40, %v629_v22  ;;  %v1505_v27 = vpop.f32.mrf.mxu0  ;;  %v1537_v28 = vpop.f32.mrf.mxu1  ;;  %v686_v31 = vmax.f32 %v510_v19, 0.0  ;;  %v718_v32 = vmax.f32 %v638_v20, 0.0 }
 0x132   :  { %1400 = vst [vmem:[#allocation7 + $0x50] sm:$0xff] %v1284_v23   ;;  %1416 = vst [vmem:[#allocation7 + $0xd0] sm:$0xff] %v1364_v24   ;;  %v513_v29 = vadd.f32 %v1505_v27, %v1709_v40  ;;  %v641_v30 = vadd.f32 %v1537_v28, %v1709_v40  ;;  %v684_v39 = vmax.f32 %v502_v25, 0.0 }
 0x133   :  { %v504_v33 = vpop.f32.mrf.mxu0  ;;  %v632_v34 = vpop.f32.mrf.mxu1  ;;  %v716_v41 = vmax.f32 %v630_v26, 0.0 }
 0x134   :  { %v687_v35 = vmax.f32 %v513_v29, 0.0  ;;  %v719_v36 = vmax.f32 %v641_v30, 0.0  ;;  %v505_v37 = vadd.f32 %v1709_v40, %v504_v33  ;;  %v633_v38 = vadd.f32 %v1709_v40, %v632_v34 }
 0x135   :  { %v1508_v42 = vpop.f32.mrf.mxu0  ;;  %v1540_v43 = vpop.f32.mrf.mxu1 }
 0x136   :  { %v1299_v44 = vpack.c.bf16 %v687_v35, %v686_v31  ;;  %v1379_v45 = vpack.c.bf16 %v719_v36, %v718_v32  ;;  %v685_v46 = vmax.f32 %v505_v37, 0.0  ;;  %v717_v47 = vmax.f32 %v633_v38, 0.0 }
 0x137   :  { %v526_v48 = vadd.f32 %v1508_v42, %v1709_v40  ;;  %v654_v49 = vadd.f32 %v1540_v43, %v1709_v40  ;;  %v517_v50 = vpop.f32.mrf.mxu0  ;;  %v645_v51 = vpop.f32.mrf.mxu1 }
 0x138   :  { %1403 = vst [vmem:[#allocation7 + $0x68] sm:$0xff] %v1299_v44   ;;  %1419 = vst [vmem:[#allocation7 + $0xe8] sm:$0xff] %v1379_v45   ;;  %v1294_v52 = vpack.c.bf16 %v685_v46, %v684_v39  ;;  %v1374_v53 = vpack.c.bf16 %v717_v47, %v716_v41  ;;  %v518_v54 = vadd.f32 %v1709_v40, %v517_v50 }
 0x139   :  { %v646_v55 = vadd.f32 %v1709_v40, %v645_v51  ;;  %v1509_v56 = vpop.f32.mrf.mxu0  ;;  %v1541_v57 = vpop.f32.mrf.mxu1  ;;  %v690_v60 = vmax.f32 %v526_v48, 0.0  ;;  %v722_v61 = vmax.f32 %v654_v49, 0.0 }
 0x13a   :  { %1402 = vst [vmem:[#allocation7 + $0x60] sm:$0xff] %v1294_v52   ;;  %1418 = vst [vmem:[#allocation7 + $0xe0] sm:$0xff] %v1374_v53   ;;  %v529_v58 = vadd.f32 %v1509_v56, %v1709_v40  ;;  %v657_v59 = vadd.f32 %v1541_v57, %v1709_v40  ;;  %v688_v4 = vmax.f32 %v518_v54, 0.0 }
 0x13b   :  { %v520_v62 = vpop.f32.mrf.mxu0  ;;  %v648_v63 = vpop.f32.mrf.mxu1  ;;  %v720_v5 = vmax.f32 %v646_v55, 0.0 }
 0x13c   :  { %v691_v0 = vmax.f32 %v529_v58, 0.0  ;;  %v723_v1 = vmax.f32 %v657_v59, 0.0  ;;  %v521_v2 = vadd.f32 %v1709_v40, %v520_v62  ;;  %v649_v3 = vadd.f32 %v1709_v40, %v648_v63 }
 0x13e   :  { %v1309_v6 = vpack.c.bf16 %v691_v0, %v690_v60  ;;  %v1389_v7 = vpack.c.bf16 %v723_v1, %v722_v61  ;;  %v689_v8 = vmax.f32 %v521_v2, 0.0  ;;  %v721_v9 = vmax.f32 %v649_v3, 0.0 }
 0x140   :  { %1405 = vst [vmem:[#allocation7 + $0x78] sm:$0xff] %v1309_v6   ;;  %1421 = vst [vmem:[#allocation7 + $0xf8] sm:$0xff] %v1389_v7   ;;  %v1304_v10 = vpack.c.bf16 %v689_v8, %v688_v4  ;;  %v1384_v11 = vpack.c.bf16 %v721_v9, %v720_v5 }
 0x142   :  { %1404 = vst [vmem:[#allocation7 + $0x70] sm:$0xff] %v1304_v10   ;;  %1420 = vst [vmem:[#allocation7 + $0xf0] sm:$0xff] %v1384_v11  }
 0x143   :  { %1654 = shalt.err (!%p1651_p0)
}
 0x144   :  { %1055 = dma.vmem_to_hbm [thread:$0]  %s1050_s24, 4096, %s1784_s3, [#allocation4], %s1670_s15, %s1670_s15, %s1671_s16  }
 0x145   :  { %1667 = dma.done.wait [#allocation4], 4096  }
 0x146   :  { %1668 = vsyncadd [#allocation4], 4294963200 }
 0x147   :  { %1059 = vsyncpa [#allocation3], 1 }
 0x148   :  { %1060 = vsyncpa [#allocation6], 1 }
 0x149   :  { %1061 = vsyncpa [#allocation4], 1 }

</bundles_post_ra>
